<compile_context>
chip_gen: v7x
topology: tpu7x:2x2x1
jax: 0.10.0
libtpu: 0.0.40
codegen_flags: <defaults>
</compile_context>

<pallas_src>
import functools

import jax
import jax.numpy as jnp
from jax.experimental import pallas as pl
from jax.experimental.pallas import tpu as pltpu

HIDDEN_SIZE = 128
INPUT_SIZE = 15
NUM_CLASSES = 7
NUM_LAYERS = 2          # fixed at 2; both layers are fused inside the kernel
HEAD_PAD = 128          # classifier head padded to a lane-dense 128 columns


def _sigmoid(v):
    # Exact: sigmoid(x) = 0.5*tanh(0.5*x) + 0.5  -> guaranteed single EUP op
    # (jax.nn.sigmoid may lower to exp + divide = 2 EUP ops on the serial path).
    return 0.5 * jnp.tanh(0.5 * v) + 0.5


def _gru_stack_kernel(x_ref,        # (T*Bp, I)   f32, time-major, batch padded
                      wih0_ref,     # (I, 3H)     f32
                      wfused_ref,   # (H, 9H)     bf16 = [whh0 | wih1 | whh1]
                      bih0_ref,     # (1, 3H)     f32  = bih0 + [bhh0_r, bhh0_z, 0]
                      bhh0n_ref,    # (1, H)      f32  = bhh0_n
                      bih1_ref,     # (1, 3H)     f32  = bih1 + [bhh1_r, bhh1_z, 0]
                      bhh1n_ref,    # (1, H)      f32  = bhh1_n
                      wfc_ref,      # (H, 128)    bf16 (cols >= C are zero)
                      bfc_ref,      # (1, 128)    f32
                      out_ref,      # (Bp, 128)   f32
                      gi0_sc,       # VMEM scratch (T*Bp, 3H) f32
                      *, batch_p, seq_len, hidden):
    B, T, H = batch_p, seq_len, hidden
    f32 = jnp.float32

    # Hoisted layer-0 input projection for ALL timesteps in one MXU call
    # (off the serial critical path, kept f32); r/z biases pre-folded into
    # bih0.  Staged in VMEM scratch so the unrolled loop only keeps one
    # timestep's slice live in vregs.
    gi0_sc[...] = (jnp.dot(x_ref[...], wih0_ref[...],
                           preferred_element_type=f32)
                   + bih0_ref[...])

    # Small biases: broadcast once, outside the recurrence (JAX does not CSE
    # broadcast_in_dim inside an unrolled loop).
    bih1 = jnp.broadcast_to(bih1_ref[...], (B, 3 * H))
    bhh0_n = jnp.broadcast_to(bhh0n_ref[...], (B, H))
    bhh1_n = jnp.broadcast_to(bhh1n_ref[...], (B, H))

    h0 = jnp.zeros((B, H), f32)
    h1 = jnp.zeros((B, H), f32)

    def gru_update(gi, gh, b_n, h):
        # torch.nn.GRU gate order (r, z, n); all elementwise math in f32.
        r = _sigmoid(gi[:, 0:H] + gh[:, 0:H])
        z = _sigmoid(gi[:, H:2 * H] + gh[:, H:2 * H])
        n = jnp.tanh(gi[:, 2 * H:] + r * (gh[:, 2 * H:] + b_n))
        return n + z * (h - n)          # == (1-z)*n + z*h, one fewer VPU op

    # Layer-skewed serial recurrence, fully unrolled (T small & static).
    # Iteration i runs layer-0 step i and layer-1 step i-1 off a SINGLE fused
    # bf16 matmul
    #     [h0[i-1]; h1[i-2]] (2B, H) @ [whh0 | wih1 | whh1] (H, 9H)
    # whose blocks of interest are gh0[i], gi1[i-1], gh1[i-1].
    #   i == 0 : both states are zero -> gh0 = 0, no matmul, no layer-1 step.
    #   i == T : epilogue; only the final layer-1 step (T-1) is taken.
    # TODO(synk): if the bundle dump shows the (H,9H) RHS being re-pushed to
    # the MXU every unrolled step, hold it resident via pltpu.matmul_push_rhs
    # / matmul_acc_lhs / matmul_pop (fits v6e/v7x staging; on v5e keep jnp.dot).
    # TODO(synk): for large T switch to lax.fori_loop(..., unroll=4-8)
    # carrying (h0, h1) instead of full Python unrolling.
    for i in range(T + 1):
        if i == 0:
            gh0 = jnp.zeros((B, 3 * H), f32)
        else:
            lhs = jnp.concatenate([h0, h1], axis=0).astype(jnp.bfloat16)
            g = jnp.dot(lhs, wfused_ref[...], preferred_element_type=f32)
            gh0 = g[0:B, 0:3 * H]                      # h0[i-1] @ whh0
            gi1 = g[0:B, 3 * H:6 * H] + bih1           # h0[i-1] @ wih1
            gh1 = g[B:2 * B, 6 * H:9 * H]              # h1[i-2] @ whh1
            h1 = gru_update(gi1, gh1, bhh1_n, h1)      # layer-1 step i-1
        if i < T:
            gi0 = gi0_sc[i * B:(i + 1) * B, :]
            h0 = gru_update(gi0, gh0, bhh0_n, h0)      # layer-0 step i

    # Lane-dense (128-wide) linear head on the top layer's final hidden state;
    # the wrapper slices back to the real NUM_CLASSES columns.
    out_ref[...] = (jnp.dot(h1.astype(jnp.bfloat16), wfc_ref[...],
                            preferred_element_type=f32)
                    + bfc_ref[...]).astype(out_ref.dtype)


def rnn_forward(x, params):
    """x: (B, T, I) float32, batch_first like the PyTorch module."""
    B, T, I = x.shape
    H, C = HIDDEN_SIZE, NUM_CLASSES

    # Pad batch to a sublane multiple so every in-kernel slice / concat is
    # (8,128)-tile aligned; padded rows are dropped at the end.
    Bp = max(8, ((B + 7) // 8) * 8)
    x_p = jnp.zeros((Bp, T, I), jnp.float32).at[:B].set(x)

    # Time-major & flattened: row t*Bp + b  <->  (timestep t, batch b).
    x2d = jnp.transpose(x_p, (1, 0, 2)).reshape(T * Bp, I)

    # Parameter prep (cheap, once per call): fold the r/z biases (they always
    # appear as b_i + b_h), fuse the per-step weights, cast critical-path MXU
    # operands to bf16.
    zeros_h = jnp.zeros((1, H), jnp.float32)
    bih0_f = params["bih0"] + jnp.concatenate(
        [params["bhh0"][:, :2 * H], zeros_h], axis=1)
    bih1_f = params["bih1"] + jnp.concatenate(
        [params["bhh1"][:, :2 * H], zeros_h], axis=1)
    bhh0_n = params["bhh0"][:, 2 * H:]
    bhh1_n = params["bhh1"][:, 2 * H:]

    wfused = jnp.concatenate(
        [params["whh0"], params["wih1"], params["whh1"]],
        axis=1).astype(jnp.bfloat16)                               # (H, 9H)

    # Lane-dense classifier head: pad C=7 -> 128 columns (unmasked vst).
    wfc_p = (jnp.zeros((H, HEAD_PAD), jnp.float32)
             .at[:, :C].set(params["wfc"]).astype(jnp.bfloat16))
    bfc_p = jnp.zeros((1, HEAD_PAD), jnp.float32).at[:, :C].set(params["bfc"])

    kernel = functools.partial(_gru_stack_kernel,
                               batch_p=Bp, seq_len=T, hidden=H)
    vmem = pl.BlockSpec(memory_space=pltpu.MemorySpace.VMEM)

    # TODO(synk): on v7x, once Bp >= 16, add a leading "parallel" batch-tile
    # grid axis so both TensorCores run independent batch shards.
    # TODO(synk): for large T*B, chunk the time axis (pltpu.emit_pipeline) and
    # stage gi0 in bf16 so the scratch stays well under v7x's 64 MiB VMEM
    # (and raise vmem_limit_bytes on v5e above the 16 MiB scoped default).
    out_p = pl.pallas_call(
        kernel,
        out_shape=jax.ShapeDtypeStruct((Bp, HEAD_PAD), jnp.float32),
        in_specs=[vmem] * 9,
        out_specs=vmem,
        scratch_shapes=[pltpu.VMEM((T * Bp, 3 * H), jnp.float32)],
    )(x2d, params["wih0"], wfused, bih0_f, bhh0_n, bih1_f, bhh1_n,
      wfc_p, bfc_p)
    return out_p[:B, :C]


def init_params(key):
    H, I, C = HIDDEN_SIZE, INPUT_SIZE, NUM_CLASSES
    k = 1.0 / jnp.sqrt(H)
    keys = jax.random.split(key, 11)
    u = lambda kk, shape: jax.random.uniform(kk, shape, jnp.float32, -k, k)
    # Stored pre-transposed: W_ih^T (in, 3H), W_hh^T (H, 3H), fc^T (H, C).
    return {
        "wih0": u(keys[0], (I, 3 * H)),
        "whh0": u(keys[1], (H, 3 * H)),
        "bih0": u(keys[2], (1, 3 * H)),
        "bhh0": u(keys[3], (1, 3 * H)),
        "wih1": u(keys[4], (H, 3 * H)),
        "whh1": u(keys[5], (H, 3 * H)),
        "bih1": u(keys[6], (1, 3 * H)),
        "bhh1": u(keys[7], (1, 3 * H)),
        "wfc":  u(keys[8], (H, C)),
        "bfc":  u(keys[9], (1, C)),
    }


def rnn_reference(x, params):
    """Pure-JAX f32 reference (same math as torch.nn.GRU + Linear)."""
    H = HIDDEN_SIZE
    B, T, _ = x.shape

    def cell(xt, h, wih, whh, bih, bhh):
        gi = xt @ wih + bih
        gh = h @ whh + bhh
        r = jax.nn.sigmoid(gi[:, 0:H] + gh[:, 0:H])
        z = jax.nn.sigmoid(gi[:, H:2 * H] + gh[:, H:2 * H])
        n = jnp.tanh(gi[:, 2 * H:] + r * gh[:, 2 * H:])
        return (1.0 - z) * n + z * h

    h0 = jnp.zeros((B, H), jnp.float32)
    h1 = jnp.zeros((B, H), jnp.float32)
    for t in range(T):
        xt = x[:, t, :]
        h0 = cell(xt, h0, params["wih0"], params["whh0"],
                  params["bih0"], params["bhh0"])
        h1 = cell(h0, h1, params["wih1"], params["whh1"],
                  params["bih1"], params["bhh1"])
    return h1 @ params["wfc"] + params["bfc"]


if __name__ == "__main__":
    key = jax.random.PRNGKey(0)
    k_x, k_p = jax.random.split(key)
    params = init_params(k_p)

    B = 2
    # Several sequence lengths exercise the layer-skew boundary conditions
    # (prologue i == 0 and epilogue i == T), including T = 1.
    for T in (1, 3, 8):
        x = jax.random.normal(jax.random.fold_in(k_x, T),
                              (B, T, INPUT_SIZE), jnp.float32)
        out = jax.block_until_ready(rnn_forward(x, params))
        ref = rnn_reference(x, params)
        assert out.shape == (B, NUM_CLASSES)
        # bf16 MXU operands on the recurrence (f32 accumulation & gate math)
        # -> loosened tolerance vs the pure-f32 reference.
        assert jnp.allclose(out, ref, atol=3e-2, rtol=3e-2), (T, out, ref)

    print("KERNEL_OK")
</pallas_src>

<mosaic_0001>
module attributes {stable_mosaic.version = 11 : i64} {
  func.func @_gru_stack_kernel(%arg0: memref<8x15xf32, #tpu.memory_space<vmem>>, %arg1: memref<15x384xf32, #tpu.memory_space<vmem>>, %arg2: memref<128x1152xbf16, #tpu.memory_space<vmem>>, %arg3: memref<1x384xf32, #tpu.memory_space<vmem>>, %arg4: memref<1x128xf32, #tpu.memory_space<vmem>>, %arg5: memref<1x384xf32, #tpu.memory_space<vmem>>, %arg6: memref<1x128xf32, #tpu.memory_space<vmem>>, %arg7: memref<128x128xbf16, #tpu.memory_space<vmem>>, %arg8: memref<1x128xf32, #tpu.memory_space<vmem>>, %arg9: memref<8x128xf32, #tpu.memory_space<vmem>>, %arg10: memref<8x384xf32, #tpu.memory_space<vmem>>) attributes {dimension_semantics = [], scalar_prefetch = 0 : i64, scratch_operands = 1 : i64, tpu.core_type = #tpu.core_type<tc>} {
    %c0 = arith.constant 0 : index
    %c0_0 = arith.constant 0 : index
    %0 = vector.load %arg0[%c0, %c0_0] : memref<8x15xf32, #tpu.memory_space<vmem>>, vector<8x15xf32>
    %c0_1 = arith.constant 0 : index
    %c0_2 = arith.constant 0 : index
    %1 = vector.load %arg1[%c0_1, %c0_2] : memref<15x384xf32, #tpu.memory_space<vmem>>, vector<15x384xf32>
    %cst = arith.constant dense<0.000000e+00> : vector<8x384xf32>
    %2 = tpu.matmul %0, %1, %cst {dimension_numbers = #tpu.dot_dimension_numbers<[1], [0], [0], [1], [0, 0, 1, 1], [], []>} : vector<8x15xf32>, vector<15x384xf32>, vector<8x384xf32> -> vector<8x384xf32>
    %c0_3 = arith.constant 0 : index
    %c0_4 = arith.constant 0 : index
    %3 = vector.load %arg3[%c0_3, %c0_4] : memref<1x384xf32, #tpu.memory_space<vmem>>, vector<1x384xf32>
    %4 = vector.broadcast %3 : vector<1x384xf32> to vector<8x384xf32>
    %5 = arith.addf %2, %4 : vector<8x384xf32>
    %c0_5 = arith.constant 0 : index
    %c0_6 = arith.constant 0 : index
    %6 = vector.load %arg10[%c0_5, %c0_6] : memref<8x384xf32, #tpu.memory_space<vmem>>, vector<8x384xf32>
    tpu.vector_store %arg10[%c0_5, %c0_6], %5 {strides = array<i32>} : memref<8x384xf32, #tpu.memory_space<vmem>>, vector<8x384xf32>,
    %c0_7 = arith.constant 0 : index
    %c0_8 = arith.constant 0 : index
    %7 = vector.load %arg5[%c0_7, %c0_8] : memref<1x384xf32, #tpu.memory_space<vmem>>, vector<1x384xf32>
    %8 = vector.shape_cast %7 : vector<1x384xf32> to vector<1x384xf32>
    %9 = vector.broadcast %8 : vector<1x384xf32> to vector<8x384xf32>
    %c0_9 = arith.constant 0 : index
    %c0_10 = arith.constant 0 : index
    %10 = vector.load %arg4[%c0_9, %c0_10] : memref<1x128xf32, #tpu.memory_space<vmem>>, vector<1x128xf32>
    %11 = vector.shape_cast %10 : vector<1x128xf32> to vector<1x128xf32>
    %12 = vector.broadcast %11 : vector<1x128xf32> to vector<8x128xf32>
    %c0_11 = arith.constant 0 : index
    %c0_12 = arith.constant 0 : index
    %13 = vector.load %arg6[%c0_11, %c0_12] : memref<1x128xf32, #tpu.memory_space<vmem>>, vector<1x128xf32>
    %14 = vector.shape_cast %13 : vector<1x128xf32> to vector<1x128xf32>
    %15 = vector.broadcast %14 : vector<1x128xf32> to vector<8x128xf32>
    %cst_13 = arith.constant 0.000000e+00 : f32
    %16 = vector.broadcast %cst_13 : f32 to vector<8x128xf32>
    %cst_14 = arith.constant 0.000000e+00 : f32
    %17 = vector.broadcast %cst_14 : f32 to vector<8x128xf32>
    %cst_15 = arith.constant 0.000000e+00 : f32
    %18 = vector.broadcast %cst_15 : f32 to vector<8x384xf32>
    %c0_16 = arith.constant 0 : index
    %c0_17 = arith.constant 0 : index
    %19 = vector.load %arg10[%c0_16, %c0_17] : memref<8x384xf32, #tpu.memory_space<vmem>>, vector<8x384xf32>
    %20 = vector.extract_strided_slice %19 {offsets = [0, 0], sizes = [8, 128], strides = [1, 1]} : vector<8x384xf32> to vector<8x128xf32>
    %21 = vector.extract_strided_slice %18 {offsets = [0, 0], sizes = [8, 128], strides = [1, 1]} : vector<8x384xf32> to vector<8x128xf32>
    %22 = arith.addf %20, %21 : vector<8x128xf32>
    %cst_18 = arith.constant 5.000000e-01 : f32
    %23 = vector.broadcast %cst_18 : f32 to vector<8x128xf32>
    %24 = arith.mulf %23, %22 : vector<8x128xf32>
    %25 = math.tanh %24 : vector<8x128xf32>
    %cst_19 = arith.constant 5.000000e-01 : f32
    %26 = vector.broadcast %cst_19 : f32 to vector<8x128xf32>
    %27 = arith.mulf %26, %25 : vector<8x128xf32>
    %cst_20 = arith.constant 5.000000e-01 : f32
    %28 = vector.broadcast %cst_20 : f32 to vector<8x128xf32>
    %29 = arith.addf %27, %28 : vector<8x128xf32>
    %30 = vector.extract_strided_slice %19 {offsets = [0, 128], sizes = [8, 128], strides = [1, 1]} : vector<8x384xf32> to vector<8x128xf32>
    %31 = vector.extract_strided_slice %18 {offsets = [0, 128], sizes = [8, 128], strides = [1, 1]} : vector<8x384xf32> to vector<8x128xf32>
    %32 = arith.addf %30, %31 : vector<8x128xf32>
    %cst_21 = arith.constant 5.000000e-01 : f32
    %33 = vector.broadcast %cst_21 : f32 to vector<8x128xf32>
    %34 = arith.mulf %33, %32 : vector<8x128xf32>
    %35 = math.tanh %34 : vector<8x128xf32>
    %cst_22 = arith.constant 5.000000e-01 : f32
    %36 = vector.broadcast %cst_22 : f32 to vector<8x128xf32>
    %37 = arith.mulf %36, %35 : vector<8x128xf32>
    %cst_23 = arith.constant 5.000000e-01 : f32
    %38 = vector.broadcast %cst_23 : f32 to vector<8x128xf32>
    %39 = arith.addf %37, %38 : vector<8x128xf32>
    %40 = vector.extract_strided_slice %19 {offsets = [0, 256], sizes = [8, 128], strides = [1, 1]} : vector<8x384xf32> to vector<8x128xf32>
    %41 = vector.extract_strided_slice %18 {offsets = [0, 256], sizes = [8, 128], strides = [1, 1]} : vector<8x384xf32> to vector<8x128xf32>
    %42 = arith.addf %41, %12 : vector<8x128xf32>
    %43 = arith.mulf %29, %42 : vector<8x128xf32>
    %44 = arith.addf %40, %43 : vector<8x128xf32>
    %45 = math.tanh %44 : vector<8x128xf32>
    %46 = arith.subf %16, %45 : vector<8x128xf32>
    %47 = arith.mulf %39, %46 : vector<8x128xf32>
    %48 = arith.addf %45, %47 : vector<8x128xf32>
    %49 = tpu.concatenate %48, %17 in 0 : vector<8x128xf32>, vector<8x128xf32> -> vector<16x128xf32>
    %50 = arith.truncf %49 : vector<16x128xf32> to vector<16x128xbf16>
    %c0_24 = arith.constant 0 : index
    %c0_25 = arith.constant 0 : index
    %51 = vector.load %arg2[%c0_24, %c0_25] : memref<128x1152xbf16, #tpu.memory_space<vmem>>, vector<128x1152xbf16>
    %cst_26 = arith.constant dense<0.000000e+00> : vector<16x1152xf32>
    %52 = tpu.matmul %50, %51, %cst_26 {dimension_numbers = #tpu.dot_dimension_numbers<[1], [0], [0], [1], [0, 0, 1, 1], [], []>} : vector<16x128xbf16>, vector<128x1152xbf16>, vector<16x1152xf32> -> vector<16x1152xf32>
    %53 = vector.extract_strided_slice %52 {offsets = [0, 384], sizes = [8, 384], strides = [1, 1]} : vector<16x1152xf32> to vector<8x384xf32>
    %54 = arith.addf %53, %9 : vector<8x384xf32>
    %55 = vector.extract_strided_slice %52 {offsets = [8, 768], sizes = [8, 384], strides = [1, 1]} : vector<16x1152xf32> to vector<8x384xf32>
    %56 = vector.extract_strided_slice %54 {offsets = [0, 0], sizes = [8, 128], strides = [1, 1]} : vector<8x384xf32> to vector<8x128xf32>
    %57 = vector.extract_strided_slice %55 {offsets = [0, 0], sizes = [8, 128], strides = [1, 1]} : vector<8x384xf32> to vector<8x128xf32>
    %58 = arith.addf %56, %57 : vector<8x128xf32>
    %cst_27 = arith.constant 5.000000e-01 : f32
    %59 = vector.broadcast %cst_27 : f32 to vector<8x128xf32>
    %60 = arith.mulf %59, %58 : vector<8x128xf32>
    %61 = math.tanh %60 : vector<8x128xf32>
    %cst_28 = arith.constant 5.000000e-01 : f32
    %62 = vector.broadcast %cst_28 : f32 to vector<8x128xf32>
    %63 = arith.mulf %62, %61 : vector<8x128xf32>
    %cst_29 = arith.constant 5.000000e-01 : f32
    %64 = vector.broadcast %cst_29 : f32 to vector<8x128xf32>
    %65 = arith.addf %63, %64 : vector<8x128xf32>
    %66 = vector.extract_strided_slice %54 {offsets = [0, 128], sizes = [8, 128], strides = [1, 1]} : vector<8x384xf32> to vector<8x128xf32>
    %67 = vector.extract_strided_slice %55 {offsets = [0, 128], sizes = [8, 128], strides = [1, 1]} : vector<8x384xf32> to vector<8x128xf32>
    %68 = arith.addf %66, %67 : vector<8x128xf32>
    %cst_30 = arith.constant 5.000000e-01 : f32
    %69 = vector.broadcast %cst_30 : f32 to vector<8x128xf32>
    %70 = arith.mulf %69, %68 : vector<8x128xf32>
    %71 = math.tanh %70 : vector<8x128xf32>
    %cst_31 = arith.constant 5.000000e-01 : f32
    %72 = vector.broadcast %cst_31 : f32 to vector<8x128xf32>
    %73 = arith.mulf %72, %71 : vector<8x128xf32>
    %cst_32 = arith.constant 5.000000e-01 : f32
    %74 = vector.broadcast %cst_32 : f32 to vector<8x128xf32>
    %75 = arith.addf %73, %74 : vector<8x128xf32>
    %76 = vector.extract_strided_slice %54 {offsets = [0, 256], sizes = [8, 128], strides = [1, 1]} : vector<8x384xf32> to vector<8x128xf32>
    %77 = vector.extract_strided_slice %55 {offsets = [0, 256], sizes = [8, 128], strides = [1, 1]} : vector<8x384xf32> to vector<8x128xf32>
    %78 = arith.addf %77, %15 : vector<8x128xf32>
    %79 = arith.mulf %65, %78 : vector<8x128xf32>
    %80 = arith.addf %76, %79 : vector<8x128xf32>
    %81 = math.tanh %80 : vector<8x128xf32>
    %82 = arith.subf %17, %81 : vector<8x128xf32>
    %83 = arith.mulf %75, %82 : vector<8x128xf32>
    %84 = arith.addf %81, %83 : vector<8x128xf32>
    %85 = arith.truncf %84 : vector<8x128xf32> to vector<8x128xbf16>
    %c0_33 = arith.constant 0 : index
    %c0_34 = arith.constant 0 : index
    %86 = vector.load %arg7[%c0_33, %c0_34] : memref<128x128xbf16, #tpu.memory_space<vmem>>, vector<128x128xbf16>
    %cst_35 = arith.constant dense<0.000000e+00> : vector<8x128xf32>
    %87 = tpu.matmul %85, %86, %cst_35 {dimension_numbers = #tpu.dot_dimension_numbers<[1], [0], [0], [1], [0, 0, 1, 1], [], []>} : vector<8x128xbf16>, vector<128x128xbf16>, vector<8x128xf32> -> vector<8x128xf32>
    %c0_36 = arith.constant 0 : index
    %c0_37 = arith.constant 0 : index
    %88 = vector.load %arg8[%c0_36, %c0_37] : memref<1x128xf32, #tpu.memory_space<vmem>>, vector<1x128xf32>
    %89 = vector.broadcast %88 : vector<1x128xf32> to vector<8x128xf32>
    %90 = arith.addf %87, %89 : vector<8x128xf32>
    %c0_38 = arith.constant 0 : index
    %c0_39 = arith.constant 0 : index
    %91 = vector.load %arg9[%c0_38, %c0_39] : memref<8x128xf32, #tpu.memory_space<vmem>>, vector<8x128xf32>
    tpu.vector_store %arg9[%c0_38, %c0_39], %90 {strides = array<i32>} : memref<8x128xf32, #tpu.memory_space<vmem>>, vector<8x128xf32>,
    return
  }
}

</mosaic_0001>

<bundles_post_ra>
// kernel: tpu_custom_call.1
= control target key start
LH: loop header
LB: loop body
LE: loop exit
PB: predicated region body
PF: predicated region fallthrough
CT: control target
= control target key end

     0   :  { %14 = vsyncpa [#allocation4], 0  ;;  %s1564_s0 = inlined_call_operand.hbm [shape: f32[8,15], index: 0, kind: input, shape index: {}]   ;;  %s1565_s1 = inlined_call_operand.hbm [shape: f32[15,384], index: 1, kind: input, shape index: {}]   ;;  %s1566_s2 = inlined_call_operand.hbm [shape: bf16[128,1152], index: 2, kind: input, shape index: {}]   ;;  %s1567_s3 = inlined_call_operand.vmem [shape: f32[1,384], index: 3, kind: input, shape index: {}]   ;;  %s1568_s4 = inlined_call_operand.vmem [shape: f32[1,128], index: 4, kind: input, shape index: {}]   ;;  %s1569_s5 = inlined_call_operand.vmem [shape: f32[1,384], index: 5, kind: input, shape index: {}]   ;;  %s1570_s6 = inlined_call_operand.vmem [shape: f32[1,128], index: 6, kind: input, shape index: {}]   ;;  %s1571_s7 = inlined_call_operand.hbm [shape: bf16[128,128], index: 7, kind: input, shape index: {}]   ;;  %s1572_s8 = inlined_call_operand.vmem [shape: f32[1,128], index: 8, kind: input, shape index: {}]   ;;  %s1573_s9 = inlined_call_operand.hbm [shape: f32[8,128], index: 9, kind: output, shape index: {}]  }
   0x1   :  { %15 = vsyncpa [#allocation7], 0 }
   0x2   :  { %16 = vsyncpa [#allocation10], 0 }
   0x3   :  { %17 = vsyncpa [#allocation5], 0  ;;  %s1369_s30 = smov [#allocation6]   ;;  %s1251_s13 = scalar_lea.hbm %s1565_s1, 768 }
   0x4   :  { %s33_s10 = sshll.u32 %s1369_s30, 4  ;;  %p1252_p0 = scmp.ne.s32.totalorder %s1565_s1, %s1251_s13  ;;  %s34_s10 = int_to_ptr.vmem [resolvable:$true] %s33_s10 }
   0x5   :  { %p1255_p1 = scmp.lt.u32.totalorder %s1251_s13, %s1565_s1 }
   0x7   :  { %p1257_p2 = pnand %p1255_p1, %p1252_p0 }
   0x9   :  { %1260 = shalt.err (!%p1257_p2)
}
   0xa   :  { %s1261_s18 = scalar_lea.vmem %s34_s10, 768  ;;  %p1266_p4 = scmp.lt.s32.totalorder %s34_s10, %s34_s10 }
   0xb   :  { %p1262_p3 = scmp.ne.s32.totalorder %s34_s10, %s1261_s18  ;;  %p1267_p5 = scmp.lt.s32.totalorder %s1261_s18, %s1261_s18 }
   0xd   :  { %p1268_p6 = por %p1267_p5, %p1266_p4 }
   0xf   :  { %p1269_p7 = pnand %p1268_p6, %p1262_p3 }
  0x11   :  { %1272 = shalt.err (!%p1269_p7)
}
  0x12   :  { %s1370_s19 = smov 384   ;;  %s1371_s20 = smov 24  }
  0x13   :  { %39 = dma.hbm_to_vmem [thread:$0]  %s1565_s1, 768, %s34_s10, [#allocation7], %s1370_s19, %s1370_s19, %s1371_s20  }
  0x14   :  { %s1372_s23 = smov [#allocation3]   ;;  %s1373_s25 = smov [#allocation8]  }
  0x15   :  { %s24_s24 = sshll.u32 %s1372_s23, 4  ;;  %s45_s26 = sshll.u32 %s1373_s25, 4  ;;  %s25_s24 = int_to_ptr.vmem [resolvable:$true] %s24_s24  ;;  %s46_s26 = int_to_ptr.vmem [resolvable:$true] %s45_s26 }
  0x16   :  { %s1273_s29 = scalar_lea.hbm %s1564_s0, 128 }
  0x17   :  { %p1274_p8 = scmp.ne.s32.totalorder %s1564_s0, %s1273_s29  ;;  %p1277_p9 = scmp.lt.u32.totalorder %s1273_s29, %s1564_s0 }
  0x19   :  { %p1279_p10 = pnand %p1277_p9, %p1274_p8 }
  0x1b   :  { %1282 = shalt.err (!%p1279_p10)
}
  0x1c   :  { %s1283_s1 = scalar_lea.vmem %s25_s24, 128  ;;  %p1288_p12 = scmp.lt.s32.totalorder %s25_s24, %s25_s24 }
  0x1d   :  { %p1284_p11 = scmp.ne.s32.totalorder %s25_s24, %s1283_s1  ;;  %p1289_p13 = scmp.lt.s32.totalorder %s1283_s1, %s1283_s1 }
  0x1f   :  { %p1290_p0 = por %p1289_p13, %p1288_p12 }
  0x21   :  { %p1291_p1 = pnand %p1290_p0, %p1284_p11 }
  0x23   :  { %1294 = shalt.err (!%p1291_p1)
}
  0x24   :  { %27 = dma.hbm_to_vmem [thread:$0]  %s1564_s0, 128, %s25_s24, [#allocation4]  }
  0x25   :  { %s1295_s17 = scalar_lea.hbm %s1566_s2, 9216 }
  0x26   :  { %p1296_p2 = scmp.ne.s32.totalorder %s1566_s2, %s1295_s17  ;;  %p1299_p3 = scmp.lt.u32.totalorder %s1295_s17, %s1566_s2 }
  0x28   :  { %p1301_p4 = pnand %p1299_p3, %p1296_p2 }
  0x2a   :  { %1304 = shalt.err (!%p1301_p4)
}
  0x2b   :  { %s1305_s22 = scalar_lea.vmem %s46_s26, 9216  ;;  %p1310_p6 = scmp.lt.s32.totalorder %s46_s26, %s46_s26 }
  0x2c   :  { %p1306_p5 = scmp.ne.s32.totalorder %s46_s26, %s1305_s22  ;;  %p1311_p7 = scmp.lt.s32.totalorder %s1305_s22, %s1305_s22 }
  0x2e   :  { %p1312_p8 = por %p1311_p7, %p1310_p6 }
  0x30   :  { %p1313_p9 = pnand %p1312_p8, %p1306_p5 }
  0x32   :  { %1316 = shalt.err (!%p1313_p9)
}
  0x33   :  { %s1374_s0 = smov 576   ;;  %s1375_s23 = smov 36  }
  0x34   :  { %51 = dma.hbm_to_vmem [thread:$0]  %s1566_s2, 9216, %s46_s26, [#allocation7], %s1374_s0, %s1374_s0, %s1375_s23  }
  0x35   :  { %s1376_s27 = smov [#allocation9]   ;;  %s1317_s11 = scalar_lea.hbm %s1571_s7, 1024 }
  0x36   :  { %s65_s28 = sshll.u32 %s1376_s27, 4  ;;  %p1318_p10 = scmp.ne.s32.totalorder %s1571_s7, %s1317_s11  ;;  %s66_s28 = int_to_ptr.vmem [resolvable:$true] %s65_s28 }
  0x37   :  { %p1321_p11 = scmp.lt.u32.totalorder %s1317_s11, %s1571_s7 }
  0x39   :  { %p1323_p12 = pnand %p1321_p11, %p1318_p10 }
  0x3b   :  { %1326 = shalt.err (!%p1323_p12)
}
  0x3c   :  { %s1327_s14 = scalar_lea.vmem %s66_s28, 1024  ;;  %p1332_p0 = scmp.lt.s32.totalorder %s66_s28, %s66_s28 }
  0x3d   :  { %p1328_p13 = scmp.ne.s32.totalorder %s66_s28, %s1327_s14  ;;  %p1333_p1 = scmp.lt.s32.totalorder %s1327_s14, %s1327_s14 }
  0x3f   :  { %p1334_p2 = por %p1333_p1, %p1332_p0 }
  0x41   :  { %p1335_p3 = pnand %p1334_p2, %p1328_p13 }
  0x43   :  { %1338 = shalt.err (!%p1335_p3)
}
  0x44   :  { %s1377_s2 = smov 64   ;;  %s1378_s26 = smov 4  }
  0x45   :  { %71 = dma.hbm_to_vmem [thread:$0]  %s1571_s7, 1024, %s66_s28, [#allocation10], %s1377_s2, %s1377_s2, %s1378_s26  }
  0x46   :  { %1361 = dma.done.wait [#allocation4], 128  }
  0x47   :  { %1362 = vsyncadd [#allocation4], 4294967168 }
  0x48   :  { %1363 = dma.done.wait [#allocation7], 9984  }
  0x49   :  { %1364 = vsyncadd [#allocation7], 4294957312 }
  0x4a   :  { %1365 = dma.done.wait [#allocation10], 1024  }
  0x4b   :  { %1366 = vsyncadd [#allocation10], 4294966272  ;;  %v1379_v0 = vmov 0.0   ;;  %vm115_vm0 = vcmask 1046528   ;;  %vm1380_vm1 = vmmov 1   ;;  %v89_v2 = vld [vmem:[#allocation6 + $0x8] sm:$0xff]  ;;  %v96_v47 = vlaneseq }
  0x4c   :  { %189 = vmatprep.mubr.f32.mxu1 %v1379_v0  ;;  %vm1484_vm2 = vmpackc.low %vm115_vm0, %vm1380_vm1  ;;  %v92_v3 = vld [vmem:[#allocation6 + $0x20] sm:$0x7f]  ;;  %v91_v6 = vld [vmem:[#allocation6 + $0x18] sm:$0x7f]  ;;  %vm111_vm3 = vcmask 121856   ;;  %v1381_v12 = vmov 0.0|0.0  }
  0x4d   :  { %v88_v4 = vld [vmem:[#allocation6] sm:$0xff]  ;;  %v1125_v5 = vpack.c.bf16 %v92_v3, %v89_v2  ;;  %v90_v7 = vld [vmem:[#allocation6 + $0x10] sm:$0xff]  ;;  %v87_v9 = vld [vmem:[#allocation3] sm:$0xff]  ;;  %vm1382_vm4 = vmmov 0   ;;  %v1383_v39 = vmov 0   ;;  %v1499_v48 = vshrl.u32 %v96_v47, 7 }
  0x4e   :  { %v1128_v8 = vpack.c.bf16 %v91_v6, %v88_v4  ;;  %v93_v10 = vld [vmem:[#allocation6 + $0x28] sm:$0x7f]  ;;  %v1151_v13 = vld [vmem:[#allocation8 + $0xc] ss:$36 sps:$4 sm:$0xff]   ;;  %v1167_v22 = vld [vmem:[#allocation8 + $0xa4] ss:$36 sps:$4 sm:$0xff]   ;;  %705 = vmatprep.mubr.bf16.mxu0 %v1383_v39 }
  0x4f   :  { %1127 = vmatprep.subr.msk.bf16.mxu1 %vm1484_vm2, %v1125_v5  ;;  %v1132_v11 = vpack.c.bf16 %v93_v10, %v90_v7  ;;  %v1155_v14 = vld [vmem:[#allocation8 + $0x14] ss:$36 sps:$4 sm:$0xff]   ;;  %v1156_v16 = vld [vmem:[#allocation8 + $0x8] ss:$36 sps:$4 sm:$0xff]   ;;  %673 = vmatprep.subr.bf16.mxu0 %v1151_v13  ;;  %v1161_v18 = vld [vmem:[#allocation8 + $0x5c] ss:$36 sps:$4 sm:$0xff]  }
  0x50   :  { %1130 = vmatpush1.bf16.msk.msra.mxu1 %vm1484_vm2, %v1128_v8  ;;  %v1153_v15 = vld [vmem:[#allocation8 + $0x10] ss:$36 sps:$4 sm:$0xff]   ;;  %674 = vmatpush1.bf16.msra.mxu0 %v1156_v16  ;;  %v1159_v19 = vld [vmem:[#allocation8 + $0x58] ss:$36 sps:$4 sm:$0xff]   ;;  %v1165_v23 = vld [vmem:[#allocation8 + $0xa0] ss:$36 sps:$4 sm:$0xff]  }
  0x51   :  { %1131 = vmatprep.subr.bf16.mxu1 %v1381_v12  ;;  %v1157_v17 = vld [vmem:[#allocation8 + $0x54] ss:$36 sps:$4 sm:$0xff]   ;;  %v1163_v21 = vld [vmem:[#allocation8 + $0x9c] ss:$36 sps:$4 sm:$0xff]   ;;  %v1169_v25 = vld [vmem:[#allocation8 + $0xe4] ss:$36 sps:$4 sm:$0xff]  }
  0x52   :  { %v1162_v20 = vld [vmem:[#allocation8 + $0x50] ss:$36 sps:$4 sm:$0xff]   ;;  %675 = vmatprep.subr.bf16.mxu0 %v1157_v17  ;;  %v1168_v24 = vld [vmem:[#allocation8 + $0x98] ss:$36 sps:$4 sm:$0xff]   ;;  %v1171_v27 = vld [vmem:[#allocation8 + $0xe8] ss:$36 sps:$4 sm:$0xff]  }
  0x53   :  { %987 = vmatmul.mubr.msk.f32.vlgmr.msra.gmra.mrb[0].mxu1 %vm111_vm3, %v87_v9  ;;  %v1173_v26 = vld [vmem:[#allocation8 + $0xec] ss:$36 sps:$4 sm:$0xff]   ;;  %v1174_v28 = vld [vmem:[#allocation8 + $0xe0] ss:$36 sps:$4 sm:$0xff]   ;;  %v1179_v31 = vld [vmem:[#allocation8 + $0x134] ss:$36 sps:$4 sm:$0xff]  }
  0x54   :  { %1134 = vmatpush3.bf16.msk.msra.mxu1 %vm1484_vm2, %v1132_v11  ;;  %1082 = vmatprep.mubr.msk.f32.mxu1 %vm1382_vm4, %v1379_v0  ;;  %v1175_v29 = vld [vmem:[#allocation8 + $0x12c] ss:$36 sps:$4 sm:$0xff]   ;;  %v1181_v33 = vld [vmem:[#allocation8 + $0x174] ss:$36 sps:$4 sm:$0xff]   ;;  %v1185_v34 = vld [vmem:[#allocation8 + $0x17c] ss:$36 sps:$4 sm:$0xff]  }
  0x55   :  { %713 = vmatprep.subr.bf16.mxu1 %v1155_v14  ;;  %676 = vmatpush1.bf16.msra.mxu0 %v1162_v20  ;;  %v1177_v30 = vld [vmem:[#allocation8 + $0x130] ss:$36 sps:$4 sm:$0xff]   ;;  %v1180_v32 = vld [vmem:[#allocation8 + $0x128] ss:$36 sps:$4 sm:$0xff]   ;;  %v1183_v35 = vld [vmem:[#allocation8 + $0x178] ss:$36 sps:$4 sm:$0xff]  }
  0x56   :  { %677 = vmatprep.subr.bf16.mxu0 %v1163_v21  ;;  %v1186_v36 = vld [vmem:[#allocation8 + $0x170] ss:$36 sps:$4 sm:$0xff]   ;;  %v1187_v37 = vld [vmem:[#allocation8 + $0x1bc] ss:$36 sps:$4 sm:$0xff]   ;;  %v1191_v38 = vld [vmem:[#allocation8 + $0x1c4] ss:$36 sps:$4 sm:$0xff]  }
  0x57   :  { %1083 = vmatmul.mubr.msk.f32.vlgmr.msra.gmra.mrb[2].mxu1 %vm111_vm3, %v87_v9  ;;  %v1189_v40 = vld [vmem:[#allocation8 + $0x1c0] ss:$36 sps:$4 sm:$0xff]   ;;  %v1192_v41 = vld [vmem:[#allocation8 + $0x1b8] ss:$36 sps:$4 sm:$0xff]   ;;  %v1197_v43 = vld [vmem:[#allocation8 + $0x20c] ss:$36 sps:$4 sm:$0xff]  }
  0x58   :  { %714 = vmatpush1.bf16.msra.mxu1 %v1153_v15  ;;  %745 = vmatprep.mubr.bf16.mxu1 %v1383_v39  ;;  %v1193_v42 = vld [vmem:[#allocation8 + $0x204] ss:$36 sps:$4 sm:$0xff]   ;;  %v1201_v46 = vld [vmem:[#allocation8 + $0x1c] ss:$36 sps:$4 sm:$0xff]   ;;  %v98_v49 = vsub.s32 0, %v1499_v48  ;;  %v102_v55 = vsub.s32 1, %v1499_v48 }
  0x59   :  { %715 = vmatprep.subr.bf16.mxu1 %v1161_v18  ;;  %678 = vmatpush1.bf16.msra.mxu0 %v1168_v24  ;;  %v1195_v44 = vld [vmem:[#allocation8 + $0x208] ss:$36 sps:$4 sm:$0xff]   ;;  %v1198_v45 = vld [vmem:[#allocation8 + $0x200] ss:$36 sps:$4 sm:$0xff]   ;;  %v106_v61 = vsub.s32 2, %v1499_v48  ;;  %s1384_s22 = smov [#allocation11]  }
  0x5a   :  { %679 = vmatprep.subr.bf16.mxu0 %v1169_v25  ;;  %v94_v50 = vld [vmem:[%s1567_s3] sm:$0x7]  ;;  %v1199_v15 = vld [vmem:[#allocation8 + $0x18] ss:$36 sps:$4 sm:$0xff]   ;;  %v1202_v16 = vld [vmem:[#allocation8 + $0x20] ss:$36 sps:$4 sm:$0xff]  }
  0x5b   :  { %v99_v51 = vrot.slane %v94_v50, %v98_v49  ;;  %v103_v59 = vrot.slane %v94_v50, %v102_v55  ;;  %v107_v63 = vrot.slane %v94_v50, %v106_v61  ;;  %v990_v3 = vld [vmem:[%s1568_s4] ss:$0 sm:$0xff]  ;;  %v1209_v21 = vld [vmem:[#allocation8 + $0xac] ss:$36 sps:$4 sm:$0xff]   ;;  %v1213_v24 = vld [vmem:[#allocation8 + $0xf4] ss:$36 sps:$4 sm:$0xff]  }
  0x5c   :  { %716 = vmatpush1.bf16.msra.mxu1 %v1159_v19  ;;  %v1205_v18 = vld [vmem:[#allocation8 + $0x64] ss:$36 sps:$4 sm:$0xff]   ;;  %v1211_v25 = vld [vmem:[#allocation8 + $0xf0] ss:$36 sps:$4 sm:$0xff]   ;;  %s974_s0 = sshll.u32 %s1384_s22, 4  ;;  %s975_s0 = int_to_ptr.vmem [resolvable:$true] %s974_s0 }
  0x5d   :  { %717 = vmatprep.subr.bf16.mxu1 %v1167_v22  ;;  %680 = vmatpush1.bf16.msra.mxu0 %v1174_v28  ;;  %v1203_v19 = vld [vmem:[#allocation8 + $0x60] ss:$36 sps:$4 sm:$0xff]   ;;  %v1206_v20 = vld [vmem:[#allocation8 + $0x68] ss:$36 sps:$4 sm:$0xff]   ;;  %v1215_v28 = vld [vmem:[#allocation8 + $0x138] ss:$36 sps:$4 sm:$0xff]   ;;  %p1344_p5 = scmp.lt.s32.totalorder %s975_s0, %s975_s0 }
  0x5e   :  { %681 = vmatprep.subr.bf16.mxu0 %v1175_v29  ;;  %v1207_v22 = vld [vmem:[#allocation8 + $0xa8] ss:$36 sps:$4 sm:$0xff]   ;;  %v1218_v29 = vld [vmem:[#allocation8 + $0x140] ss:$36 sps:$4 sm:$0xff]   ;;  %s1339_s23 = scalar_lea.vmem %s975_s0, 128 }
  0x5f   :  { %v1048_v48 = vld [vmem:[%s1572_s8] ss:$0 sm:$0xff]  ;;  %p1340_p4 = scmp.ne.s32.totalorder %s975_s0, %s1339_s23  ;;  %p1345_p6 = scmp.lt.s32.totalorder %s1339_s23, %s1339_s23 }
  0x60   :  { %718 = vmatpush1.bf16.msra.mxu1 %v1165_v23  ;;  %v1210_v23 = vld [vmem:[#allocation8 + $0xb0] ss:$36 sps:$4 sm:$0xff]  }
  0x61   :  { %719 = vmatprep.subr.bf16.mxu1 %v1173_v26  ;;  %682 = vmatpush1.bf16.msra.mxu0 %v1180_v32  ;;  %v1214_v26 = vld [vmem:[#allocation8 + $0xf8] ss:$36 sps:$4 sm:$0xff]   ;;  %v1222_v32 = vld [vmem:[#allocation8 + $0x188] ss:$36 sps:$4 sm:$0xff]   ;;  %p1346_p7 = por %p1345_p6, %p1344_p5 }
  0x62   :  { %683 = vmatprep.subr.bf16.mxu0 %v1181_v33  ;;  %v1225_v33 = vld [vmem:[#allocation8 + $0x1cc] ss:$36 sps:$4 sm:$0xff]  }
  0x63   :  { %p1347_p8 = pnand %p1346_p7, %p1340_p4 }
  0x64   :  { %720 = vmatpush1.bf16.msra.mxu1 %v1171_v27  ;;  %v1217_v27 = vld [vmem:[#allocation8 + $0x13c] ss:$36 sps:$4 sm:$0xff]  }
  0x65   :  { %721 = vmatprep.subr.bf16.mxu1 %v1179_v31  ;;  %684 = vmatpush1.bf16.msra.mxu0 %v1186_v36  ;;  %v1219_v31 = vld [vmem:[#allocation8 + $0x180] ss:$36 sps:$4 sm:$0xff]   ;;  %v1229_v36 = vld [vmem:[#allocation8 + $0x214] ss:$36 sps:$4 sm:$0xff]  }
  0x66   :  { %685 = vmatprep.subr.bf16.mxu0 %v1187_v37  ;;  %v1227_v37 = vld [vmem:[#allocation8 + $0x210] ss:$36 sps:$4 sm:$0xff]  }
  0x68   :  { %722 = vmatpush1.bf16.msra.mxu1 %v1177_v30  ;;  %v1221_v30 = vld [vmem:[#allocation8 + $0x184] ss:$36 sps:$4 sm:$0xff]  }
  0x69   :  { %723 = vmatprep.subr.bf16.mxu1 %v1185_v34  ;;  %686 = vmatpush1.bf16.msra.mxu0 %v1192_v41  ;;  %v1223_v34 = vld [vmem:[#allocation8 + $0x1c8] ss:$36 sps:$4 sm:$0xff]   ;;  %v1233_v41 = vld [vmem:[#allocation9 + $0x10] sm:$0xff]  }
  0x6a   :  { %687 = vmatprep.subr.bf16.mxu0 %v1193_v42  ;;  %v1234_v42 = vld [vmem:[#allocation9 + $0x18] sm:$0xff]  }
  0x6c   :  { %724 = vmatpush1.bf16.msra.mxu1 %v1183_v35  ;;  %v1226_v35 = vld [vmem:[#allocation8 + $0x1d0] ss:$36 sps:$4 sm:$0xff]  }
  0x6d   :  { %725 = vmatprep.subr.bf16.mxu1 %v1191_v38  ;;  %688 = vmatpush1.bf16.msra.mxu0 %v1198_v45  ;;  %v1230_v38 = vld [vmem:[#allocation8 + $0x218] ss:$36 sps:$4 sm:$0xff]   ;;  %v1237_v45 = vld [vmem:[#allocation9 + $0x30] sm:$0xff]  }
  0x6e   :  { %754 = vmatprep.subr.bf16.mxu0 %v1201_v46  ;;  %v1238_v46 = vld [vmem:[#allocation9 + $0x38] sm:$0xff]  }
  0x70   :  { %726 = vmatpush1.bf16.msra.mxu1 %v1189_v40  ;;  %v1232_v40 = vld [vmem:[#allocation9 + $0x8] sm:$0xff]  }
  0x71   :  { %727 = vmatprep.subr.bf16.mxu1 %v1197_v43  ;;  %v1235_v43 = vld [vmem:[#allocation9 + $0x20] sm:$0xff]  }
  0x74   :  { %728 = vmatpush1.bf16.msra.mxu1 %v1195_v44  ;;  %v1236_v44 = vld [vmem:[#allocation9 + $0x28] sm:$0xff]  }
  0x75   :  { %1085 = vmatprep.subr.bf16.mxu1 %v1379_v0 }
 0x126   :  { %v191_v52 = vpop.f32.mrb[0].mxu1 }
 0x127   :  { %v192_v53 = vadd.f32 %v191_v52, %v99_v51  ;;  %v193_v54 = vpop.f32.mrb[1].mxu1 }
 0x128   :  { %v194_v60 = vadd.f32 %v193_v54, %v103_v59 }
 0x129   :  { %v304_v56 = vmul.f32 0.5, %v192_v53 }
 0x12a   :  { %v262_v57 = vpop.f32.mrb[2].mxu1  ;;  %v309_v62 = vmul.f32 0.5, %v194_v60 }
 0x12b   :  { %1239 = vtanh.f32 %v304_v56  ;;  %v1084_v58 = vpop.f32.mrb[3].mxu1  ;;  %v263_v5 = vadd.f32 %v262_v57, %v107_v63 }
 0x12c   :  { %1241 = vtanh.f32 %v309_v62  ;;  %v269_v58 = vld [vmem:[%s1569_s5] sm:$0x7] }
 0x12d   :  { %v274_v59 = vrot.slane %v269_v58, %v98_v49  ;;  %v991_v49 = vld [vmem:[%s1570_s6] ss:$0 sm:$0xff] }
 0x135   :  { %v1240_v1 = vpop.eup %1239 }
 0x136   :  { %v306_v2 = vmul.f32 0.5, %v1240_v1  ;;  %v1242_v8 = vpop.eup %1241 }
 0x137   :  { %v311_v9 = vmul.f32 0.5, %v1242_v8 }
 0x138   :  { %v307_v4 = vadd.f32 0.5, %v306_v2 }
 0x139   :  { %v312_v11 = vadd.f32 0.5, %v311_v9 }
 0x13a   :  { %v314_v6 = vmul.f32 %v990_v3, %v307_v4 }
 0x13c   :  { %v315_v7 = vadd.f32 %v314_v6, %v263_v5 }
 0x13e   :  { %1243 = vtanh.f32 %v315_v7 }
 0x148   :  { %v1244_v10 = vpop.eup %1243 }
 0x149   :  { %v317_v12 = vsub.f32 0.0, %v1244_v10 }
 0x14b   :  { %v318_v13 = vmul.f32 %v317_v12, %v312_v11 }
 0x14d   :  { %v319_v14 = vadd.f32 %v1244_v10, %v318_v13 }
 0x14f   :  { %v320_v17 = vpack.c.bf16 %v1379_v0, %v319_v14 }
 0x151   :  { %706 = vmatmul.mubr.bf16.vlgmr.msra.gmra.mrb[0].mxu0 %v320_v17  ;;  %746 = vmatmul.mubr.bf16.vlgmr.msra.gmra.mrb[4].mxu1 %v320_v17 }
 0x152   :  { %755 = vmatpush1.bf16.msra.mxu0 %v1199_v15  ;;  %1086 = vmatpush3.bf16.msra.mxu1 %v1202_v16 }
 0x153   :  { %756 = vmatprep.subr.bf16.mxu0 %v1205_v18  ;;  %1087 = vmatprep.subr.bf16.mxu1 %v1379_v0 }
 0x154   :  { %786 = vmatprep.mubr.bf16.mxu0 %v1383_v39  ;;  %1101 = vmatprep.mubr.msk.bf16.mxu1 %vm1382_vm4, %v1379_v0  ;;  %v1231_v39 = vld [vmem:[#allocation9] sm:$0xff]  }
 0x156   :  { %757 = vmatpush1.bf16.msra.mxu0 %v1203_v19  ;;  %1088 = vmatpush3.bf16.msra.mxu1 %v1206_v20 }
 0x157   :  { %758 = vmatprep.subr.bf16.mxu0 %v1209_v21  ;;  %1089 = vmatprep.subr.bf16.mxu1 %v1379_v0 }
 0x15a   :  { %759 = vmatpush1.bf16.msra.mxu0 %v1207_v22  ;;  %1090 = vmatpush3.bf16.msra.mxu1 %v1210_v23 }
 0x15b   :  { %760 = vmatprep.subr.bf16.mxu0 %v1213_v24  ;;  %1091 = vmatprep.subr.bf16.mxu1 %v1379_v0 }
 0x15e   :  { %761 = vmatpush1.bf16.msra.mxu0 %v1211_v25  ;;  %1092 = vmatpush3.bf16.msra.mxu1 %v1214_v26 }
 0x15f   :  { %762 = vmatprep.subr.bf16.mxu0 %v1217_v27  ;;  %1093 = vmatprep.subr.bf16.mxu1 %v1379_v0 }
 0x162   :  { %763 = vmatpush1.bf16.msra.mxu0 %v1215_v28  ;;  %1094 = vmatpush3.bf16.msra.mxu1 %v1218_v29 }
 0x163   :  { %764 = vmatprep.subr.bf16.mxu0 %v1221_v30  ;;  %1095 = vmatprep.subr.bf16.mxu1 %v1379_v0 }
 0x166   :  { %765 = vmatpush1.bf16.msra.mxu0 %v1219_v31  ;;  %1096 = vmatpush3.bf16.msra.mxu1 %v1222_v32 }
 0x167   :  { %766 = vmatprep.subr.bf16.mxu0 %v1225_v33  ;;  %1097 = vmatprep.subr.bf16.mxu1 %v1379_v0 }
 0x16a   :  { %767 = vmatpush1.bf16.msra.mxu0 %v1223_v34  ;;  %1098 = vmatpush3.bf16.msra.mxu1 %v1226_v35 }
 0x16b   :  { %768 = vmatprep.subr.bf16.mxu0 %v1229_v36  ;;  %1099 = vmatprep.subr.bf16.mxu1 %v1379_v0 }
 0x16e   :  { %769 = vmatpush1.bf16.msra.mxu0 %v1227_v37  ;;  %1100 = vmatpush3.bf16.msra.mxu1 %v1230_v38 }
 0x16f   :  { %1105 = vmatprep.subr.bf16.mxu0 %v1379_v0 }
 0x171   :  { %787 = vmatmul.mubr.bf16.vlgmr.msra.gmra.mrb[4].mxu0 %v320_v17  ;;  %1102 = vmatmul.mubr.bf16.vlgmr.msra.gmra.mrb[8].mxu1 %v320_v17 }
 0x172   :  { %1121 = vmatprep.mubr.msk.bf16.mxu0 %vm1382_vm4, %v1379_v0  ;;  %1106 = vmatpush3.bf16.msra.mxu0 %v1231_v39 }
 0x173   :  { %1107 = vmatprep.subr.bf16.mxu0 %v1379_v0 }
 0x176   :  { %1108 = vmatpush3.bf16.msra.mxu0 %v1232_v40 }
 0x177   :  { %1109 = vmatprep.subr.bf16.mxu0 %v1379_v0 }
 0x17a   :  { %1110 = vmatpush3.bf16.msra.mxu0 %v1233_v41 }
 0x17b   :  { %1111 = vmatprep.subr.bf16.mxu0 %v1379_v0 }
 0x17e   :  { %1112 = vmatpush3.bf16.msra.mxu0 %v1234_v42 }
 0x17f   :  { %1113 = vmatprep.subr.bf16.mxu0 %v1379_v0 }
 0x182   :  { %1114 = vmatpush3.bf16.msra.mxu0 %v1235_v43 }
 0x183   :  { %1115 = vmatprep.subr.bf16.mxu0 %v1379_v0 }
 0x186   :  { %1116 = vmatpush3.bf16.msra.mxu0 %v1236_v44 }
 0x187   :  { %1117 = vmatprep.subr.bf16.mxu0 %v1379_v0 }
 0x18a   :  { %1118 = vmatpush3.bf16.msra.mxu0 %v1237_v45 }
 0x18b   :  { %1119 = vmatprep.subr.bf16.mxu0 %v1379_v0  ;;  %v278_v0 = vrot.slane %v269_v58, %v102_v55  ;;  %v282_v55 = vrot.slane %v269_v58, %v106_v61 }
 0x18e   :  { %1120 = vmatpush3.bf16.msra.mxu0 %v1238_v46 }
 0x224   :  { %v707_v47 = vpop.f32.mrb[0].mxu0  ;;  %v747_v50 = vpop.f32.mrb[4].mxu1 }
 0x225   :  { %v708_v51 = vpop.f32.mrb[1].mxu0  ;;  %v749_v52 = vpop.f32.mrb[5].mxu1  ;;  %v836_v3 = vadd.f32 %v747_v50, %v278_v0 }
 0x226   :  { %v710_v53 = vpop.f32.mrb[2].mxu0  ;;  %v751_v54 = vpop.f32.mrb[6].mxu1  ;;  %v835_v63 = vadd.f32 %v708_v51, %v274_v59  ;;  %v837_v16 = vadd.f32 %v749_v52, %v282_v55 }
 0x227   :  { %v711_v56 = vpop.f32.mrb[3].mxu0  ;;  %v752_v57 = vpop.f32.mrb[7].mxu1 }
 0x244   :  { %v788_v60 = vpop.f32.mrb[4].mxu0  ;;  %v829_v62 = vpop.f32.mrb[8].mxu1 }
 0x245   :  { %v789_v1 = vpop.f32.mrb[5].mxu0  ;;  %v1103_v2 = vpop.f32.mrb[9].mxu1 }
 0x246   :  { %v790_v4 = vpop.f32.mrb[6].mxu0  ;;  %v831_v5 = vpop.f32.mrb[10].mxu1 }
 0x247   :  { %v838_v6 = vadd.f32 %v835_v63, %v790_v4  ;;  %v792_v7 = vpop.f32.mrb[7].mxu0  ;;  %v1104_v8 = vpop.f32.mrb[11].mxu1  ;;  %v848_v15 = vadd.f32 %v991_v49, %v831_v5 }
 0x248   :  { %v843_v9 = vadd.f32 %v836_v3, %v792_v7 }
 0x249   :  { %v839_v10 = vmul.f32 0.5, %v838_v6 }
 0x24a   :  { %v844_v11 = vmul.f32 0.5, %v843_v9 }
 0x24b   :  { %1245 = vtanh.f32 %v839_v10 }
 0x24c   :  { %1247 = vtanh.f32 %v844_v11 }
 0x255   :  { %v1246_v12 = vpop.eup %1245 }
 0x256   :  { %v841_v13 = vmul.f32 0.5, %v1246_v12  ;;  %v1248_v19 = vpop.eup %1247 }
 0x257   :  { %v846_v20 = vmul.f32 0.5, %v1248_v19 }
 0x258   :  { %v842_v14 = vadd.f32 0.5, %v841_v13 }
 0x259   :  { %v847_v22 = vadd.f32 0.5, %v846_v20 }
 0x25a   :  { %v849_v17 = vmul.f32 %v848_v15, %v842_v14 }
 0x25c   :  { %v850_v18 = vadd.f32 %v849_v17, %v837_v16 }
 0x25e   :  { %1249 = vtanh.f32 %v850_v18 }
 0x268   :  { %v1250_v21 = vpop.eup %1249 }
 0x269   :  { %v852_v23 = vsub.f32 0.0, %v1250_v21 }
 0x26b   :  { %v853_v24 = vmul.f32 %v852_v23, %v847_v22 }
 0x26d   :  { %v854_v25 = vadd.f32 %v1250_v21, %v853_v24 }
 0x26f   :  { %v855_v26 = vpack.c.bf16 %v854_v25, %v854_v25 }
 0x271   :  { %1122 = vmatmul.mubr.bf16.vlgmr.msra.gmra.mrb[8].mxu0 %v855_v26 }
 0x344   :  { %v961_v61 = vpop.f32.mrb[8].mxu0 }
 0x345   :  { %v962_v27 = vadd.f32 %v1048_v48, %v961_v61  ;;  %v1123_v28 = vpop.f32.mrb[9].mxu0 }
 0x346   :  { %v964_v29 = vpop.f32.mrb[10].mxu0 }
 0x347   :  { %967 = vst [vmem:[#allocation11] sm:$0xff] %v962_v27  ;;  %v1124_v30 = vpop.f32.mrb[11].mxu0 }
 0x348   :  { %1350 = shalt.err (!%p1347_p8)
}
 0x349   :  { %s1351_s8 = scalar_lea.hbm %s1573_s9, 128 }
 0x34a   :  { %p1352_p9 = scmp.ne.s32.totalorder %s1573_s9, %s1351_s8  ;;  %p1355_p10 = scmp.lt.u32.totalorder %s1351_s8, %s1573_s9 }
 0x34c   :  { %p1357_p11 = pnand %p1355_p10, %p1352_p9 }
 0x34e   :  { %1360 = shalt.err (!%p1357_p11)
}
 0x34f   :  { %977 = dma.vmem_to_hbm [thread:$0]  %s975_s0, 128, %s1573_s9, [#allocation5]  }
 0x350   :  { %1367 = dma.done.wait [#allocation5], 128  }
 0x351   :  { %1368 = vsyncadd [#allocation5], 4294967168 }
 0x352   :  { %981 = vsyncpa [#allocation4], 1 }
 0x353   :  { %982 = vsyncpa [#allocation7], 1 }
 0x354   :  { %983 = vsyncpa [#allocation10], 1 }
 0x355   :  { %984 = vsyncpa [#allocation5], 1 }

</bundles_post_ra>
